<compile_context>
chip_gen: v5e
topology: v5e:2x2
jax: 0.10.0
libtpu: 0.0.40
codegen_flags: <defaults>
</compile_context>

<pallas_src>
import math
import numpy as np
import jax
import jax.numpy as jnp
from jax.experimental import pallas as pl
from jax.experimental.pallas import tpu as pltpu


# ----------------------------------------------------------------------------
# Haar wavelet low-pass analysis matrices, constructed exactly like
# DWT_2D_tiny.get_matrix() in the PyTorch reference (wavename='haar').
# ----------------------------------------------------------------------------
def _haar_low_matrices_np(input_height: int, input_width: int):
    # pywt.Wavelet('haar').rec_lo == [1/sqrt(2), 1/sqrt(2)]
    band_low = [1.0 / math.sqrt(2.0), 1.0 / math.sqrt(2.0)]
    band_length = len(band_low)              # 2
    band_length_half = band_length // 2      # 1

    L1 = max(input_height, input_width)
    L = L1 // 2
    matrix_h = np.zeros((L, L1 + band_length - 2), dtype=np.float64)

    end = None if band_length_half == 1 else -band_length_half + 1
    index = 0
    for i in range(L):
        for j in range(band_length):
            matrix_h[i, index + j] = band_low[j]
        index += 2

    matrix_h_0 = matrix_h[0:input_height // 2, 0:input_height + band_length - 2]
    matrix_h_1 = matrix_h[0:input_width // 2, 0:input_width + band_length - 2]

    matrix_h_0 = matrix_h_0[:, band_length_half - 1:end]          # (H//2, H)
    matrix_h_1 = matrix_h_1[:, band_length_half - 1:end]
    matrix_h_1 = np.transpose(matrix_h_1)                          # (W, W//2)
    return matrix_h_0, matrix_h_1


def _fused_dwt_matrix_np(H: int, W: int, fold: int) -> np.ndarray:
    """M such that  vec(L0 @ X @ L1) = vec(X) @ M,  repeated block-diagonally
    `fold` times so `fold` images packed in one row are transformed at once."""
    l0, l1 = _haar_low_matrices_np(H, W)          # (H//2, H), (W, W//2)
    m = np.kron(l0.T, l1)                         # (H*W, (H//2)*(W//2))
    if fold > 1:
        hw_in, hw_out = m.shape
        mf = np.zeros((fold * hw_in, fold * hw_out), dtype=np.float64)
        for s in range(fold):
            mf[s * hw_in:(s + 1) * hw_in, s * hw_out:(s + 1) * hw_out] = m
        m = mf
    return m.astype(np.float32)


# ----------------------------------------------------------------------------
# Pallas kernel: one fused MXU matmul per (large, lane-dense) block of images.
# ----------------------------------------------------------------------------
def _wavec_ll_kernel(m_ref, x_ref, o_ref):
    o_ref[...] = jnp.dot(
        x_ref[...], m_ref[...], preferred_element_type=jnp.float32
    ).astype(o_ref.dtype)


def wavec_layer(x: jax.Array, *, target_block_bytes: int = 2 * 1024 * 1024) -> jax.Array:
    """WaveCLayer forward: low-frequency DWT component. x: (N, C, H, W)."""
    N, C, H, W = x.shape
    assert H % 2 == 0 and W % 2 == 0
    Ho, Wo = H // 2, W // 2
    hw_in, hw_out = H * W, Ho * Wo
    NC = N * C
    itemsize = jnp.dtype(x.dtype).itemsize

    # Fold several images per row so the output lane dim is a multiple of 128
    # (lane-dense stores), when possible.
    fold = 1
    for cand in (1, 2, 4, 8):
        if (cand * hw_out) % 128 == 0:
            fold = cand
            break

    row_in = fold * hw_in
    row_out = fold * hw_out

    # Rows (of `fold` packed images) per grid block: aim for ~2 MiB input blocks.
    rows_needed = pl.cdiv(NC, fold)
    rows_per_block = max(8, (target_block_bytes // (row_in * itemsize)) // 8 * 8)
    if rows_needed <= rows_per_block:
        rows_per_block = rows_needed           # full-extent block (any size OK)
        rows_padded = rows_needed
    else:
        rows_padded = pl.cdiv(rows_needed, rows_per_block) * rows_per_block
    grid = rows_padded // rows_per_block

    nc_padded = rows_padded * fold
    x_flat = x.reshape(NC, hw_in)              # contiguous (free) reshape
    if nc_padded != NC:
        x_flat = jnp.pad(x_flat, ((0, nc_padded - NC), (0, 0)))
    x_rows = x_flat.reshape(rows_padded, row_in)

    m = jnp.asarray(_fused_dwt_matrix_np(H, W, fold))   # (row_in, row_out) f32

    flops = 2 * rows_padded * row_in * row_out
    bytes_accessed = (
        rows_padded * row_in * itemsize
        + rows_padded * row_out * itemsize
        + m.size * 4
    )

    out_rows = pl.pallas_call(
        _wavec_ll_kernel,
        out_shape=jax.ShapeDtypeStruct((rows_padded, row_out), x.dtype),
        grid=(grid,),
        in_specs=[
            pl.BlockSpec((row_in, row_out), lambda i: (0, 0)),      # fused DWT matrix (constant)
            pl.BlockSpec((rows_per_block, row_in), lambda i: (i, 0)),  # lane-dense image block
        ],
        out_specs=pl.BlockSpec((rows_per_block, row_out), lambda i: (i, 0)),
        compiler_params=pltpu.CompilerParams(
            dimension_semantics=("parallel",),
            vmem_limit_bytes=32 * 1024 * 1024,
        ),
        cost_estimate=pl.CostEstimate(
            flops=int(flops), transcendentals=0, bytes_accessed=int(bytes_accessed)
        ),
    )(m, x_rows)

    out = out_rows.reshape(nc_padded, hw_out)[:NC]
    return out.reshape(N, C, Ho, Wo)


# ----------------------------------------------------------------------------
# Plain-JAX reference for verification.
# ----------------------------------------------------------------------------
def wavec_layer_ref(x: jax.Array) -> jax.Array:
    N, C, H, W = x.shape
    l0_np, l1_np = _haar_low_matrices_np(H, W)
    l0 = jnp.asarray(l0_np, dtype=jnp.float32)    # (H//2, H)
    l1 = jnp.asarray(l1_np, dtype=jnp.float32)    # (W, W//2)
    low = jnp.einsum("iH,ncHw->nciw", l0, x)      # (N, C, H//2, W)
    ll = jnp.einsum("nciw,wj->ncij", low, l1)     # (N, C, H//2, W//2)
    return ll


if __name__ == "__main__":
    key = jax.random.PRNGKey(0)
    N, C, H, W = 2, 4, 16, 16
    x = jax.random.normal(key, (N, C, H, W), dtype=jnp.float32)

    out = jax.block_until_ready(wavec_layer(x))
    ref = jax.block_until_ready(wavec_layer_ref(x))

    assert out.shape == (N, C, H // 2, W // 2), out.shape
    assert jnp.allclose(out, ref, atol=1e-5, rtol=1e-5), "mismatch vs reference"

    print("KERNEL_OK")
</pallas_src>

<mosaic_0001>
module attributes {stable_mosaic.version = 11 : i64} {
  func.func @_wavec_ll_kernel(%arg0: i32, %arg1: memref<512x128xf32, #tpu.memory_space<vmem>>, %arg2: memref<4x512xf32, #tpu.memory_space<vmem>>, %arg3: memref<4x128xf32, #tpu.memory_space<vmem>>) attributes {dimension_semantics = [#tpu.dimension_semantics<parallel>], iteration_bounds = array<i64: 1>, scalar_prefetch = 0 : i64, scratch_operands = 0 : i64, tpu.core_type = #tpu.core_type<tc>, window_params = [{pipeline_mode = #tpu.pipeline_mode<synchronous>, transform_indices = @transform_0, window_bounds = array<i64: 512, 128>}, {transform_indices = @transform_1, window_bounds = array<i64: 4, 512>}, {transform_indices = @transform_2, window_bounds = array<i64: 4, 128>}]} {
    %c0 = arith.constant 0 : index
    %c0_0 = arith.constant 0 : index
    %0 = vector.load %arg2[%c0, %c0_0] : memref<4x512xf32, #tpu.memory_space<vmem>>, vector<4x512xf32>
    %c0_1 = arith.constant 0 : index
    %c0_2 = arith.constant 0 : index
    %1 = vector.load %arg1[%c0_1, %c0_2] : memref<512x128xf32, #tpu.memory_space<vmem>>, vector<512x128xf32>
    %cst = arith.constant dense<0.000000e+00> : vector<4x128xf32>
    %2 = tpu.matmul %0, %1, %cst {dimension_numbers = #tpu.dot_dimension_numbers<[1], [0], [0], [1], [0, 0, 1, 1], [], []>} : vector<4x512xf32>, vector<512x128xf32>, vector<4x128xf32> -> vector<4x128xf32>
    %c0_3 = arith.constant 0 : index
    %c0_4 = arith.constant 0 : index
    %3 = vector.load %arg3[%c0_3, %c0_4] : memref<4x128xf32, #tpu.memory_space<vmem>>, vector<4x128xf32>
    tpu.vector_store %arg3[%c0_3, %c0_4], %2 {strides = array<i32>} : memref<4x128xf32, #tpu.memory_space<vmem>>, vector<4x128xf32>,
    return
  }
  func.func @transform_0(%arg0: i32) -> (i32, i32) {
    %c0_i32 = arith.constant 0 : i32
    %c0_i32_0 = arith.constant 0 : i32
    %c0_i32_1 = arith.constant 0 : i32
    return %c0_i32, %c0_i32_0 : i32, i32
  }
  func.func @transform_1(%arg0: i32) -> (i32, i32) {
    %c0_i32 = arith.constant 0 : i32
    %c0_i32_0 = arith.constant 0 : i32
    return %arg0, %c0_i32 : i32, i32
  }
  func.func @transform_2(%arg0: i32) -> (i32, i32) {
    %c0_i32 = arith.constant 0 : i32
    %c0_i32_0 = arith.constant 0 : i32
    return %arg0, %c0_i32 : i32, i32
  }
}

</mosaic_0001>

<bundles_post_ra>
// kernel: tpu_custom_call.1
= control target key start
LH: loop header
LB: loop body
LE: loop exit
PB: predicated region body
PF: predicated region fallthrough
CT: control target
= control target key end

     0   :  { %7 = vsyncpa [#allocation3], 0  ;;  %s332_s0 = inlined_call_operand.hbm [shape: f32[512,128], index: 0, kind: input, shape index: {}]   ;;  %s333_s1 = inlined_call_operand.hbm [shape: f32[4,512], index: 1, kind: input, shape index: {}]   ;;  %s334_s2 = inlined_call_operand.hbm [shape: f32[4,128], index: 2, kind: output, shape index: {}]  }
   0x1   :  { %8 = vsyncpa [#allocation6], 0 }
   0x2   :  { %9 = vsyncpa [#allocation4], 0  ;;  %s14_s11 = sshll.u32 %s332_s0, 4  ;;  %s303_s12 = smov [#allocation2]   ;;  %s15_s11 = int_to_ptr.hbm [resolvable:$true] %s14_s11 }
   0x3   :  { %s16_s13 = sshll.u32 %s303_s12, 4  ;;  %s28_s16 = sshll.u32 %s333_s1, 4  ;;  %s17_s13 = int_to_ptr.vmem [resolvable:$true] %s16_s13  ;;  %s29_s16 = int_to_ptr.hbm [resolvable:$true] %s28_s16 }
   0x4   :  { %s304_s17 = smov 128   ;;  %s305_s18 = smov 8  }
   0x5   :  { %22 = dma.hbm_to_vmem [thread:$0]  %s15_s11, 8192, %s17_s13, [#allocation3], %s304_s17, %s304_s17, %s305_s18  }
   0x6   :  { %s306_s19 = smov [#allocation5]  }
   0x7   :  { %s30_s20 = sshll.u32 %s306_s19, 4  ;;  %s31_s20 = int_to_ptr.vmem [resolvable:$true] %s30_s20 }
   0x8   :  { %33 = dma.hbm_to_vmem [thread:$0]  %s29_s16, 256, %s31_s20, [#allocation6]  }
   0x9   :  { %297 = dma.done.wait [#allocation3], 8192  }
   0xa   :  { %298 = vsyncadd [#allocation3], 4294959104 }
   0xb   :  { %299 = dma.done.wait [#allocation6], 256  }
   0xc   :  { %300 = vsyncadd [#allocation6], 4294967040  ;;  %v91_v0 = vld [vmem:[#allocation2 + $0x178] sm:$0xff]  ;;  %v90_v1 = vld [vmem:[#allocation2 + $0x170] sm:$0xff]  ;;  %s307_s0 = smov [#allocation7]   ;;  %s209_s23 = sshll.u32 %s334_s2, 4  ;;  %s210_s23 = int_to_ptr.hbm [resolvable:$true] %s209_s23 }
   0xd   :  { %v107_v2 = vld [vmem:[#allocation2 + $0x1f8] sm:$0xff]  ;;  %161 = vmatpush.msra.mxu2 %v91_v0  ;;  %v89_v5 = vld [vmem:[#allocation2 + $0x168] sm:$0xff]  ;;  %v106_v6 = vld [vmem:[#allocation2 + $0x1f0] sm:$0xff]  ;;  %s207_s1 = sshll.u32 %s307_s0, 4  ;;  %s208_s1 = int_to_ptr.vmem [resolvable:$true] %s207_s1 }
   0xe   :  { %181 = vmatpush.msra.mxu3 %v107_v2  ;;  %v59_v3 = vld [vmem:[#allocation2 + $0x78] sm:$0xff]  ;;  %v58_v7 = vld [vmem:[#allocation2 + $0x70] sm:$0xff]  ;;  %v105_v9 = vld [vmem:[#allocation2 + $0x1e8] sm:$0xff] }
   0xf   :  { %v75_v4 = vld [vmem:[#allocation2 + $0xf8] sm:$0xff]  ;;  %121 = vmatpush.msra.mxu0 %v59_v3  ;;  %v74_v8 = vld [vmem:[#allocation2 + $0xf0] sm:$0xff]  ;;  %162 = vmatpush.msra.mxu2 %v90_v1  ;;  %v57_v10 = vld [vmem:[#allocation2 + $0x68] sm:$0xff] }
  0x10   :  { %141 = vmatpush.msra.mxu1 %v75_v4  ;;  %182 = vmatpush.msra.mxu3 %v106_v6  ;;  %v88_v11 = vld [vmem:[#allocation2 + $0x160] sm:$0xff]  ;;  %v73_v12 = vld [vmem:[#allocation2 + $0xe8] sm:$0xff]  ;;  %v87_v16 = vld [vmem:[#allocation2 + $0x158] sm:$0xff] }
  0x11   :  { %122 = vmatpush.msra.mxu0 %v58_v7  ;;  %v104_v13 = vld [vmem:[#allocation2 + $0x1e0] sm:$0xff]  ;;  %163 = vmatpush.msra.mxu2 %v89_v5  ;;  %v103_v17 = vld [vmem:[#allocation2 + $0x1d8] sm:$0xff]  ;;  %v86_v20 = vld [vmem:[#allocation2 + $0x150] sm:$0xff] }
  0x12   :  { %142 = vmatpush.msra.mxu1 %v74_v8  ;;  %183 = vmatpush.msra.mxu3 %v105_v9  ;;  %v56_v14 = vld [vmem:[#allocation2 + $0x60] sm:$0xff]  ;;  %v55_v18 = vld [vmem:[#allocation2 + $0x58] sm:$0xff]  ;;  %v102_v21 = vld [vmem:[#allocation2 + $0x1d0] sm:$0xff] }
  0x13   :  { %v72_v15 = vld [vmem:[#allocation2 + $0xe0] sm:$0xff]  ;;  %123 = vmatpush.msra.mxu0 %v57_v10  ;;  %164 = vmatpush.msra.mxu2 %v88_v11  ;;  %v71_v19 = vld [vmem:[#allocation2 + $0xd8] sm:$0xff]  ;;  %v54_v22 = vld [vmem:[#allocation2 + $0x50] sm:$0xff] }
  0x14   :  { %143 = vmatpush.msra.mxu1 %v73_v12  ;;  %184 = vmatpush.msra.mxu3 %v104_v13  ;;  %v70_v23 = vld [vmem:[#allocation2 + $0xd0] sm:$0xff]  ;;  %v85_v24 = vld [vmem:[#allocation2 + $0x148] sm:$0xff]  ;;  %v84_v28 = vld [vmem:[#allocation2 + $0x140] sm:$0xff] }
  0x15   :  { %124 = vmatpush.msra.mxu0 %v56_v14  ;;  %165 = vmatpush.msra.mxu2 %v87_v16  ;;  %v101_v25 = vld [vmem:[#allocation2 + $0x1c8] sm:$0xff]  ;;  %v100_v29 = vld [vmem:[#allocation2 + $0x1c0] sm:$0xff]  ;;  %v83_v32 = vld [vmem:[#allocation2 + $0x138] sm:$0xff] }
  0x16   :  { %144 = vmatpush.msra.mxu1 %v72_v15  ;;  %185 = vmatpush.msra.mxu3 %v103_v17  ;;  %v53_v26 = vld [vmem:[#allocation2 + $0x48] sm:$0xff]  ;;  %v52_v30 = vld [vmem:[#allocation2 + $0x40] sm:$0xff]  ;;  %v99_v33 = vld [vmem:[#allocation2 + $0x1b8] sm:$0xff] }
  0x17   :  { %125 = vmatpush.msra.mxu0 %v55_v18  ;;  %166 = vmatpush.msra.mxu2 %v86_v20  ;;  %v69_v27 = vld [vmem:[#allocation2 + $0xc8] sm:$0xff]  ;;  %v68_v31 = vld [vmem:[#allocation2 + $0xc0] sm:$0xff]  ;;  %v51_v34 = vld [vmem:[#allocation2 + $0x38] sm:$0xff] }
  0x18   :  { %145 = vmatpush.msra.mxu1 %v71_v19  ;;  %186 = vmatpush.msra.mxu3 %v102_v21  ;;  %v67_v35 = vld [vmem:[#allocation2 + $0xb8] sm:$0xff]  ;;  %v82_v36 = vld [vmem:[#allocation2 + $0x130] sm:$0xff]  ;;  %v81_v40 = vld [vmem:[#allocation2 + $0x128] sm:$0xff] }
  0x19   :  { %126 = vmatpush.msra.mxu0 %v54_v22  ;;  %167 = vmatpush.msra.mxu2 %v85_v24  ;;  %v98_v37 = vld [vmem:[#allocation2 + $0x1b0] sm:$0xff]  ;;  %v97_v41 = vld [vmem:[#allocation2 + $0x1a8] sm:$0xff]  ;;  %v80_v45 = vld [vmem:[#allocation2 + $0x120] sm:$0xff] }
  0x1a   :  { %146 = vmatpush.msra.mxu1 %v70_v23  ;;  %187 = vmatpush.msra.mxu3 %v101_v25  ;;  %v50_v38 = vld [vmem:[#allocation2 + $0x30] sm:$0xff]  ;;  %v49_v42 = vld [vmem:[#allocation2 + $0x28] sm:$0xff]  ;;  %v96_v46 = vld [vmem:[#allocation2 + $0x1a0] sm:$0xff] }
  0x1b   :  { %127 = vmatpush.msra.mxu0 %v53_v26  ;;  %168 = vmatpush.msra.mxu2 %v84_v28  ;;  %v66_v39 = vld [vmem:[#allocation2 + $0xb0] sm:$0xff]  ;;  %v65_v43 = vld [vmem:[#allocation2 + $0xa8] sm:$0xff]  ;;  %v48_v47 = vld [vmem:[#allocation2 + $0x20] sm:$0xff] }
  0x1c   :  { %147 = vmatpush.msra.mxu1 %v69_v27  ;;  %188 = vmatpush.msra.mxu3 %v100_v29  ;;  %v43_v44 = vld [vmem:[#allocation5 + $0x8] sm:$0xff]  ;;  %v64_v48 = vld [vmem:[#allocation2 + $0xa0] sm:$0xff]  ;;  %v79_v50 = vld [vmem:[#allocation2 + $0x118] sm:$0xff] }
  0x1d   :  { %128 = vmatpush.msra.mxu0 %v52_v30  ;;  %169 = vmatpush.msra.mxu2 %v83_v32  ;;  %112 = vst [vmem:[#allocation1 + $0x10] ss:$2 sm:$0xff] %v43_v44  ;;  %v42_v49 = vld [vmem:[#allocation5] sm:$0xff]  ;;  %v95_v51 = vld [vmem:[#allocation2 + $0x198] sm:$0xff]  ;;  %v78_v54 = vld [vmem:[#allocation2 + $0x110] sm:$0xff] }
  0x1e   :  { %148 = vmatpush.msra.mxu1 %v68_v31  ;;  %189 = vmatpush.msra.mxu3 %v99_v33  ;;  %110 = vst [vmem:[#allocation1] ss:$2 sm:$0xff] %v42_v49  ;;  %v47_v52 = vld [vmem:[#allocation2 + $0x18] sm:$0xff]  ;;  %v94_v55 = vld [vmem:[#allocation2 + $0x190] sm:$0xff]  ;;  %v77_v58 = vld [vmem:[#allocation2 + $0x108] sm:$0xff] }
  0x1f   :  { %129 = vmatpush.msra.mxu0 %v51_v34  ;;  %170 = vmatpush.msra.mxu2 %v82_v36  ;;  %v63_v53 = vld [vmem:[#allocation2 + $0x98] sm:$0xff]  ;;  %v46_v56 = vld [vmem:[#allocation2 + $0x10] sm:$0xff]  ;;  %v93_v59 = vld [vmem:[#allocation2 + $0x188] sm:$0xff] }
  0x20   :  { %149 = vmatpush.msra.mxu1 %v67_v35  ;;  %190 = vmatpush.msra.mxu3 %v98_v37  ;;  %v62_v57 = vld [vmem:[#allocation2 + $0x90] sm:$0xff]  ;;  %v45_v60 = vld [vmem:[#allocation2 + $0x8] sm:$0xff]  ;;  %v76_v62 = vld [vmem:[#allocation2 + $0x100] sm:$0xff] }
  0x21   :  { %130 = vmatpush.msra.mxu0 %v50_v38  ;;  %171 = vmatpush.msra.mxu2 %v81_v40  ;;  %v61_v61 = vld [vmem:[#allocation2 + $0x88] sm:$0xff]  ;;  %v92_v63 = vld [vmem:[#allocation2 + $0x180] sm:$0xff] }
  0x22   :  { %150 = vmatpush.msra.mxu1 %v66_v39  ;;  %191 = vmatpush.msra.mxu3 %v97_v41  ;;  %v44_v2 = vld [vmem:[#allocation2] sm:$0xff] }
  0x23   :  { %131 = vmatpush.msra.mxu0 %v49_v42  ;;  %172 = vmatpush.msra.mxu2 %v80_v45  ;;  %v60_v3 = vld [vmem:[#allocation2 + $0x80] sm:$0xff] }
  0x24   :  { %151 = vmatpush.msra.mxu1 %v65_v43  ;;  %192 = vmatpush.msra.mxu3 %v96_v46  ;;  %v115_v0 = vld.sshfl [vmem:[#allocation1 + $0x10] sm:$0xff pattern:$0x75316420]  ;;  %v116_v1 = vld.sshfl [vmem:[#allocation1 + $0x18] sm:$0xff pattern:$0x75316420] }
  0x25   :  { %132 = vmatpush.msra.mxu0 %v48_v47  ;;  %173 = vmatpush.msra.mxu2 %v79_v50  ;;  %v113_v4 = vld.sshfl [vmem:[#allocation1] sm:$0xff pattern:$0x75316420]  ;;  %v114_v5 = vld.sshfl [vmem:[#allocation1 + $0x8] sm:$0xff pattern:$0x75316420] }
  0x26   :  { %152 = vmatpush.msra.mxu1 %v64_v48  ;;  %193 = vmatpush.msra.mxu3 %v95_v51 }
  0x27   :  { %133 = vmatpush.msra.mxu0 %v47_v52  ;;  %174 = vmatpush.msra.mxu2 %v78_v54 }
  0x28   :  { %153 = vmatpush.msra.mxu1 %v63_v53  ;;  %194 = vmatpush.msra.mxu3 %v94_v55 }
  0x29   :  { %134 = vmatpush.msra.mxu0 %v46_v56  ;;  %175 = vmatpush.msra.mxu2 %v77_v58 }
  0x2a   :  { %154 = vmatpush.msra.mxu1 %v62_v57  ;;  %195 = vmatpush.msra.mxu3 %v93_v59 }
  0x2b   :  { %135 = vmatpush.msra.mxu0 %v45_v60  ;;  %176 = vmatpush.msra.mxu2 %v76_v62 }
  0x2c   :  { %155 = vmatpush.msra.mxu1 %v61_v61  ;;  %196 = vmatpush.msra.mxu3 %v92_v63 }
  0x2d   :  { %177 = vmatmul.f32.vlgmr.msra.gmra.mxu2 %v115_v0  ;;  %197 = vmatmul.f32.vlgmr.msra.gmra.mxu3 %v116_v1 }
  0x2e   :  { %136 = vmatpush.msra.mxu0 %v44_v2  ;;  %156 = vmatpush.msra.mxu1 %v60_v3 }
  0x2f   :  { %137 = vmatmul.f32.vlgmr.msra.gmra.mxu0 %v113_v4  ;;  %157 = vmatmul.f32.vlgmr.msra.gmra.mxu1 %v114_v5 }
  0xac   :  { %v138_v6 = vpop.f32.mrf.mxu0  ;;  %v158_v7 = vpop.f32.mrf.mxu1 }
  0xad   :  { %v159_v8 = vadd.f32 %v158_v7, %v138_v6 }
  0xb0   :  { %v178_v9 = vpop.f32.mrf.mxu2  ;;  %v198_v10 = vpop.f32.mrf.mxu3 }
  0xb1   :  { %v179_v11 = vadd.f32 %v178_v9, %v159_v8 }
  0xb3   :  { %v199_v12 = vadd.f32 %v198_v10, %v179_v11 }
  0xb5   :  { %201 = vst [vmem:[#allocation7] sm:$0xf] %v199_v12 }
  0xb6   :  { %212 = dma.vmem_to_hbm [thread:$0]  %s208_s1, 64, %s210_s23, [#allocation4]  }
  0xb7   :  { %301 = dma.done.wait [#allocation4], 64  }
  0xb8   :  { %302 = vsyncadd [#allocation4], 4294967232 }
  0xb9   :  { %217 = vsyncpa [#allocation3], 1 }
  0xba   :  { %218 = vsyncpa [#allocation6], 1 }
  0xbb   :  { %219 = vsyncpa [#allocation4], 1 }

</bundles_post_ra>
